<compile_context>
chip_gen: v7x
topology: tpu7x:2x2x1
jax: 0.10.0
libtpu: 0.0.40
codegen_flags: <defaults>
</compile_context>

<pallas_src>
import numpy as np
import jax
import jax.numpy as jnp
from jax.experimental import pallas as pl
from jax.experimental.pallas import tpu as pltpu

OUT_SIZE = 44
GRAY_W = (0.2989, 0.587, 0.114)      # torchvision rgb_to_grayscale weights
NORM_MEAN = 0.421
NORM_STD = 0.165
NORM_BIAS = NORM_MEAN / NORM_STD     # epilogue subtract; 1/(255*std) folded into wh

TB_TARGET = 32   # frames per grid step; multiple of 32 keeps out-lane blocks 128-aligned


def _resize_matrix(in_size: int, out_size: int) -> np.ndarray:
    """PIL/torchvision antialiased bilinear resize expressed as a (out, in) matrix."""
    scale = in_size / out_size
    filterscale = max(scale, 1.0)
    support = 1.0 * filterscale  # bilinear (triangle) kernel support
    W = np.zeros((out_size, in_size), dtype=np.float32)
    for i in range(out_size):
        center = (i + 0.5) * scale
        xmin = max(int(center - support + 0.5), 0)
        xmax = min(int(center + support + 0.5), in_size)
        idx = list(range(xmin, xmax))
        ws = [max(0.0, 1.0 - abs((j - center + 0.5) / filterscale)) for j in idx]
        total = sum(ws)
        for j, w in zip(idx, ws):
            W[i, j] = w / total
    return W


# ----------------------------- video kernel -----------------------------
def _video_kernel(x_ref, wg_ref, wh_ref, out_ref):
    # x_ref  : (TB*H, 3W) uint8  channels-last rows (frame-major, image-row minor)
    # wg_ref : (3W, 44)   bf16   grayscale x width-resize folded
    # wh_ref : (44, H)    f32    height-resize, scaled by 1/(255*NORM_STD)
    # out_ref: (44, TB*44) f32   lane-dense: column t*44 + k
    H = wh_ref.shape[1]
    TB = x_ref.shape[0] // H

    # uint8 -> bf16 is exact; grayscale + width resize = ONE big MXU matmul.
    xb = x_ref[...].astype(jnp.bfloat16)
    r1 = jnp.dot(xb, wg_ref[...], preferred_element_type=jnp.float32)   # (TB*H, 44)

    # Relayout (TB, H, 44) -> (H, TB*44) so the height resize is a single batched,
    # lane-dense matmul instead of TB tiny 44xHx44 dots.
    r1 = r1.reshape(TB, H, OUT_SIZE)
    r1 = jnp.transpose(r1, (1, 0, 2)).reshape(H, TB * OUT_SIZE)          # (H, TB*44)

    # Height resize (f32 for accuracy; /255 and 1/std are folded into wh).
    out_ref[...] = (
        jnp.dot(wh_ref[...], r1, preferred_element_type=jnp.float32) - NORM_BIAS)


def video_transform(video: jax.Array, tb: int = TB_TARGET) -> jax.Array:
    """video: (T, 3, H, W) uint8 mouth crops -> (T, 1, 44, 44) float32.

    Assumes square-ish crops (both spatial dims resized to 44, matching the
    tutorial's square mouth ROI).
    """
    if video.dtype != jnp.uint8:
        # Torch reference does numpy .astype(np.uint8); values assumed in [0, 255].
        video = video.astype(jnp.uint8)
    T, C, H, W = video.shape
    assert C == 3

    # Tiling: big frame batches amortize the ~0.35us/step grid overhead; an even
    # number of blocks load-balances the "parallel" axis over v7x's 2 TensorCores.
    if T <= tb:
        TB, n_blocks = T, 1                      # single block: block == full dims
    else:
        TB = tb
        n_blocks = pl.cdiv(T, TB)
        n_blocks += n_blocks % 2                 # even block count for megacore
    T_pad = TB * n_blocks

    # Channels-last 2D layout: row t*H + h, column w*3 + c  (lane dim = 3W >= 128).
    x2d = jnp.transpose(video, (0, 2, 3, 1)).reshape(T * H, 3 * W)
    if T_pad != T:
        x2d = jnp.pad(x2d, ((0, (T_pad - T) * H), (0, 0)))

    rw = _resize_matrix(W, OUT_SIZE)             # (44, W)
    rh = _resize_matrix(H, OUT_SIZE)             # (44, H)
    # Fold grayscale into the width matrix: wg[w*3 + c, k] = GRAY_W[c] * rw[k, w].
    wg_np = (rw.T[:, None, :] * np.asarray(GRAY_W, np.float32)[None, :, None])
    wg = jnp.asarray(wg_np.reshape(3 * W, OUT_SIZE), dtype=jnp.bfloat16)
    # Normalize(0, 255) and the 1/0.165 scale folded into the (f32) height matrix.
    wh = jnp.asarray(rh / (255.0 * NORM_STD), dtype=jnp.float32)

    cost = pl.CostEstimate(
        flops=int(2 * T_pad * H * 3 * W * OUT_SIZE          # width+gray matmul
                  + 2 * T_pad * OUT_SIZE * H * OUT_SIZE),   # height matmul
        transcendentals=0,
        bytes_accessed=int(T_pad * H * 3 * W                # uint8 frames in
                           + T_pad * OUT_SIZE * OUT_SIZE * 4
                           + (3 * W + H) * OUT_SIZE * 4),
    )

    out_flat = pl.pallas_call(
        _video_kernel,
        out_shape=jax.ShapeDtypeStruct((OUT_SIZE, T_pad * OUT_SIZE), jnp.float32),
        grid=(n_blocks,),
        in_specs=[
            pl.BlockSpec((TB * H, 3 * W), lambda t: (t, 0)),
            pl.BlockSpec((3 * W, OUT_SIZE), lambda t: (0, 0)),
            pl.BlockSpec((OUT_SIZE, H), lambda t: (0, 0)),
        ],
        out_specs=pl.BlockSpec((OUT_SIZE, TB * OUT_SIZE), lambda t: (0, t)),
        compiler_params=pltpu.CompilerParams(dimension_semantics=("parallel",)),
        cost_estimate=cost,
    )(x2d, wg, wh)

    # (44, T_pad*44) -> (T, 1, 44, 44); tiny wrapper-side relayout, padded tail
    # frames (garbage rows) are sliced off here.
    out = out_flat.reshape(OUT_SIZE, T_pad, OUT_SIZE)[:, :T, :]
    return jnp.transpose(out, (1, 0, 2))[:, None, :, :]


# ----------------------------- audio kernel -----------------------------
def _audio_kernel(a_ref, o_ref):
    # a_ref: (C, BS) channel-major (samples on the lane axis) -> o_ref: (1, BS)
    o_ref[...] = jnp.mean(a_ref[...], axis=0, keepdims=True)


def audio_transform(audio: jax.Array, bs_max: int = 32768) -> jax.Array:
    """audio: (S, C) float32 -> (S, 1) float32 (channel mean, keepdim).

    Large blocks so realistic clips run in 1-4 grid steps (a C=2 channel mean is
    almost pure launch overhead; jnp.mean would also be acceptable here).
    """
    S, C = audio.shape
    a = jnp.asarray(audio, jnp.float32).T                 # (C, S): lane-dense layout
    BS = min(bs_max, pl.cdiv(S, 128) * 128)
    n_blocks = pl.cdiv(S, BS)
    S_pad = n_blocks * BS
    if S_pad != S:
        a = jnp.pad(a, ((0, 0), (0, S_pad - S)))
    out = pl.pallas_call(
        _audio_kernel,
        out_shape=jax.ShapeDtypeStruct((1, S_pad), jnp.float32),
        grid=(n_blocks,),
        in_specs=[pl.BlockSpec((C, BS), lambda i: (0, i))],
        out_specs=pl.BlockSpec((1, BS), lambda i: (0, i)),
        compiler_params=pltpu.CompilerParams(dimension_semantics=("parallel",)),
    )(a)
    return out[0, :S, None]                               # (S, 1)


# ----------------------------- wrapper -----------------------------
def preprocessing_forward(audio: jax.Array, video: jax.Array):
    """Equivalent of Preprocessing.forward on the (post-crop) uint8 video + audio."""
    return audio_transform(audio), video_transform(video)


if __name__ == "__main__":
    key = jax.random.PRNGKey(0)
    k_a, k_v = jax.random.split(key)

    # Small synthetic shapes: 8 cropped mouth frames of 64x64 RGB, 256 stereo samples.
    T, C, H, W = 8, 3, 64, 64
    S = 256
    video = jax.random.randint(k_v, (T, C, H, W), 0, 256, dtype=jnp.int32).astype(
        jnp.uint8
    )
    audio = jax.random.normal(k_a, (S, 2), dtype=jnp.float32)

    audio_out, video_out = preprocessing_forward(audio, video)
    jax.block_until_ready((audio_out, video_out))

    # --- pure-numpy reference (resize-first ordering; linear => same result) ---
    vf = np.asarray(video).astype(np.float64)
    rh_np = _resize_matrix(H, OUT_SIZE).astype(np.float64)       # (44, H)
    rwT_np = _resize_matrix(W, OUT_SIZE).astype(np.float64).T    # (W, 44)
    resized = np.einsum("oh,tchw,wk->tcok", rh_np, vf, rwT_np) / 255.0
    gray = (GRAY_W[0] * resized[:, 0] + GRAY_W[1] * resized[:, 1]
            + GRAY_W[2] * resized[:, 2])
    ref_video = ((gray - NORM_MEAN) / NORM_STD)[:, None, :, :]
    ref_audio = np.asarray(audio).astype(np.float64).mean(axis=-1, keepdims=True)

    assert audio_out.shape == (S, 1)
    assert video_out.shape == (T, 1, OUT_SIZE, OUT_SIZE)
    err = np.abs(np.asarray(video_out) - ref_video)
    # 3e-2 tolerance: the width/grayscale matrix is bf16 (~0.4% relative weight
    # rounding); the height matmul and all accumulation stay in f32.
    assert np.max(err) < 3e-2, np.max(err)
    assert np.mean(err) < 1e-2
    assert np.max(np.abs(np.asarray(audio_out) - ref_audio)) < 1e-5
    print("KERNEL_OK")
</pallas_src>

<mosaic_0001>
module attributes {stable_mosaic.version = 11 : i64} {
  func.func @_audio_kernel(%arg0: i32, %arg1: memref<2x256xf32, #tpu.memory_space<vmem>>, %arg2: memref<1x256xf32, #tpu.memory_space<vmem>>) attributes {dimension_semantics = [#tpu.dimension_semantics<parallel>], iteration_bounds = array<i64: 1>, scalar_prefetch = 0 : i64, scratch_operands = 0 : i64, tpu.core_type = #tpu.core_type<tc>, window_params = [{transform_indices = @transform_0, window_bounds = array<i64: 2, 256>}, {transform_indices = @transform_1, window_bounds = array<i64: 1, 256>}]} {
    %c0 = arith.constant 0 : index
    %c0_0 = arith.constant 0 : index
    %0 = vector.load %arg1[%c0, %c0_0] : memref<2x256xf32, #tpu.memory_space<vmem>>, vector<2x256xf32>
    %cst = arith.constant dense<0.000000e+00> : vector<256xf32>
    %1 = vector.multi_reduction <add>, %0, %cst [0] : vector<2x256xf32> to vector<256xf32>
    %2 = vector.shape_cast %1 : vector<256xf32> to vector<1x256xf32>
    %cst_1 = arith.constant 2.000000e+00 : f32
    %3 = vector.broadcast %cst_1 : f32 to vector<1x256xf32>
    %4 = arith.divf %2, %3 : vector<1x256xf32>
    %c0_2 = arith.constant 0 : index
    %c0_3 = arith.constant 0 : index
    %5 = vector.load %arg2[%c0_2, %c0_3] : memref<1x256xf32, #tpu.memory_space<vmem>>, vector<1x256xf32>
    tpu.vector_store %arg2[%c0_2, %c0_3], %4 {strides = array<i32>} : memref<1x256xf32, #tpu.memory_space<vmem>>, vector<1x256xf32>,
    return
  }
  func.func @transform_0(%arg0: i32) -> (i32, i32) {
    %c0_i32 = arith.constant 0 : i32
    %c0_i32_0 = arith.constant 0 : i32
    return %c0_i32, %arg0 : i32, i32
  }
  func.func @transform_1(%arg0: i32) -> (i32, i32) {
    %c0_i32 = arith.constant 0 : i32
    %c0_i32_0 = arith.constant 0 : i32
    return %c0_i32, %arg0 : i32, i32
  }
}

</mosaic_0001>

<bundles_post_ra>
// kernel: tpu_custom_call.1
= control target key start
LH: loop header
LB: loop body
LE: loop exit
PB: predicated region body
PF: predicated region fallthrough
CT: control target
= control target key end

     0   :  { %6 = vsyncpa [#allocation3], 0  ;;  %s178_s0 = inlined_call_operand.hbm [shape: f32[2,256], index: 0, kind: input, shape index: {}]   ;;  %s179_s1 = inlined_call_operand.hbm [shape: f32[1,256], index: 1, kind: output, shape index: {}]  }
   0x1   :  { %7 = vsyncpa [#allocation4], 0  ;;  %s141_s6 = smov [#allocation2]   ;;  %s93_s10 = scalar_lea.hbm %s178_s0, 64 }
   0x2   :  { %s14_s7 = sshll.u32 %s141_s6, 4  ;;  %p94_p0 = scmp.ne.s32.totalorder %s178_s0, %s93_s10  ;;  %s15_s7 = int_to_ptr.vmem [resolvable:$true] %s14_s7 }
   0x3   :  { %p97_p1 = scmp.lt.u32.totalorder %s93_s10, %s178_s0 }
   0x5   :  { %p99_p2 = pnand %p97_p1, %p94_p0 }
   0x7   :  { %102 = shalt.err (!%p99_p2)
}
   0x8   :  { %s103_s15 = scalar_lea.vmem %s15_s7, 64  ;;  %p108_p4 = scmp.lt.s32.totalorder %s15_s7, %s15_s7 }
   0x9   :  { %p104_p3 = scmp.ne.s32.totalorder %s15_s7, %s103_s15  ;;  %p109_p5 = scmp.lt.s32.totalorder %s103_s15, %s103_s15 }
   0xb   :  { %p110_p6 = por %p109_p5, %p108_p4 }
   0xd   :  { %p111_p7 = pnand %p110_p6, %p104_p3 }
   0xf   :  { %114 = shalt.err (!%p111_p7)
}
  0x10   :  { %17 = dma.hbm_to_vmem [thread:$0]  %s178_s0, 64, %s15_s7, [#allocation3]  }
  0x11   :  { %137 = dma.done.wait [#allocation3], 64  }
  0x12   :  { %138 = vsyncadd [#allocation3], 4294967232  ;;  %vm33_vm0 = vcmask 1041408   ;;  %v142_v11 = vmov 1966171168   ;;  %v57_v13 = vlaneseq  ;;  %s143_s0 = smov [#allocation5]  }
  0x13   :  { %v89_v0 = vld.sshfl [vmem:[#allocation2] sm:$0x33 pattern:$0x76325410]  ;;  %v55_v12 = vunpack.c.l.s4 %v142_v11  ;;  %s80_s18 = sshll.u32 %s143_s0, 4  ;;  %s81_s18 = int_to_ptr.vmem [resolvable:$true] %s80_s18 }
  0x14   :  { %v30_v1 = vcombine.high %v89_v0, %v89_v0  ;;  %v34_v2 = vsel %vm33_vm0, %v89_v0, 0.0  ;;  %v58_v19 = vshrl.u32 %v57_v13, 7  ;;  %vm71_vm1 = vcmp.lt.s32.totalorder %v57_v13, 256  ;;  %s115_s19 = scalar_lea.vmem %s81_s18, 32  ;;  %p120_p9 = scmp.lt.s32.totalorder %s81_s18, %s81_s18 }
  0x15   :  { %v35_v3 = vrot.slane %v34_v2, 4  ;;  %v56_v18 = vunpack.c.0.s8 %v55_v12  ;;  %p116_p8 = scmp.ne.s32.totalorder %s81_s18, %s115_s19  ;;  %p121_p10 = scmp.lt.s32.totalorder %s115_s19, %s115_s19 }
  0x16   :  { %v41_v4 = vsel %vm33_vm0, %v30_v1, 0.0 }
  0x17   :  { %v36_v5 = vadd.f32 %v35_v3, %v34_v2  ;;  %v42_v6 = vrot.slane %v41_v4, 4  ;;  %v59_v23 = vsub.s32 %v56_v18, %v58_v19  ;;  %p122_p11 = por %p121_p10, %p120_p9 }
  0x19   :  { %v37_v7 = vrot.slane %v36_v5, 2  ;;  %v43_v8 = vadd.f32 %v42_v6, %v41_v4  ;;  %p123_p12 = pnand %p122_p11, %p116_p8 }
  0x1b   :  { %v38_v9 = vadd.f32 %v37_v7, %v36_v5  ;;  %v44_v10 = vrot.slane %v43_v8, 2 }
  0x1d   :  { %v39_v14 = vrot.slane %v38_v9, 1  ;;  %v45_v15 = vadd.f32 %v44_v10, %v43_v8 }
  0x1f   :  { %v40_v16 = vadd.f32 %v39_v14, %v38_v9  ;;  %v46_v17 = vrot.slane %v45_v15, 1 }
  0x21   :  { %v47_v20 = vadd.f32 %v46_v17, %v45_v15  ;;  %v49_v21 = vmul.f32 0.5, %v40_v16 }
  0x23   :  { %v50_v22 = vmul.f32 0.5, %v47_v20 }
  0x25   :  { %v53_v24 = vcombine.low %v49_v21, %v50_v22 }
  0x27   :  { %v60_v25 = vrot.slane %v53_v24, %v59_v23 }
  0x29   :  { %v67_v26 = vrot.slane %v60_v25, %v59_v23 }
  0x2b   :  { %73 = vst.msk [vmem:[#allocation5] sm:$0x3] %vm71_vm1, %v67_v26 }
  0x2c   :  { %126 = shalt.err (!%p123_p12)
}
  0x2d   :  { %s127_s22 = scalar_lea.hbm %s179_s1, 32 }
  0x2e   :  { %p128_p13 = scmp.ne.s32.totalorder %s179_s1, %s127_s22  ;;  %p131_p0 = scmp.lt.u32.totalorder %s127_s22, %s179_s1 }
  0x30   :  { %p133_p1 = pnand %p131_p0, %p128_p13 }
  0x32   :  { %136 = shalt.err (!%p133_p1)
}
  0x33   :  { %83 = dma.vmem_to_hbm [thread:$0]  %s81_s18, 32, %s179_s1, [#allocation4]  }
  0x34   :  { %139 = dma.done.wait [#allocation4], 32  }
  0x35   :  { %140 = vsyncadd [#allocation4], 4294967264 }
  0x36   :  { %87 = vsyncpa [#allocation3], 1 }
  0x37   :  { %88 = vsyncpa [#allocation4], 1 }

</bundles_post_ra>
